<compile_context>
chip_gen: v6e
topology: v6e:2x2x1
jax: 0.10.0
libtpu: 0.0.40
codegen_flags: <defaults>
</compile_context>

<pallas_src>
import math
from functools import partial

import jax
import jax.numpy as jnp
from jax import lax
from jax.experimental import pallas as pl
from jax.experimental.pallas import tpu as pltpu


def _gelu_tanh(x):
    # PyTorch nn.GELU(approximate='tanh'):
    # 0.5 * x * (1 + tanh(sqrt(2/pi) * (x + 0.044715 * x^3)))
    c = math.sqrt(2.0 / math.pi)
    return 0.5 * x * (1.0 + jnp.tanh(c * (x + 0.044715 * x * x * x)))


def _round_up(n, m):
    return ((n + m - 1) // m) * m


def _cdiv(a, b):
    return (a + b - 1) // b


def _align_dim(n):
    """128-align; prefer 256 (v6e/v7x MXU tile) when the extra padding is small."""
    p128 = _round_up(n, 128)
    if n >= 256:
        p256 = _round_up(n, 256)
        if p256 == p128 or (p256 - n) <= n // 8:
            return p256
    return p128


def _pick_h_chunk(h_pad, max_chunk):
    """Largest chunk dividing h_pad, preferring 256 granularity, capped at max_chunk."""
    max_chunk = min(max_chunk, h_pad)
    for step in (256, 128):
        best = 0
        c = step
        while c <= max_chunk:
            if h_pad % c == 0:
                best = c
            c += step
        if best:
            return best
    return h_pad


def _pick_tm(m, target):
    """M tile: multiple of 16, low padding waste, >=2 tiles when M is big (v7x 2 TCs)."""
    n_tiles = max(1, _cdiv(m, target))
    tm = _round_up(_cdiv(m, n_tiles), 16)
    if m > 256 and _round_up(m, tm) // tm < 2:
        tm = _round_up(_cdiv(m, 2), 16)
    return tm


def _vmem_capacity_bytes():
    try:
        return int(pltpu.get_tpu_info().vmem_capacity_bytes)
    except Exception:
        return 64 << 20  # conservative: v7x per-TensorCore capacity


def _vmem_resident_bytes(tm, c_pad, h_pad, th, in_b, out_b):
    return int(2 * (2 * c_pad * h_pad) * in_b      # W1 + W2 (counted double-buffered)
               + 2 * (h_pad + c_pad) * 4           # b1 + b2 (f32)
               + 2 * tm * c_pad * in_b             # x tiles (double-buffered)
               + 2 * tm * c_pad * out_b            # output tiles
               + tm * c_pad * 4                    # f32 accumulator scratch
               + tm * th * (4 + in_b))             # h (f32) + gelu (bf16) temps


def _vmem_stream_bytes(tm, c_pad, th, in_b, out_b):
    return int(2 * tm * c_pad * in_b               # x tiles
               + 2 * c_pad * th * in_b             # W1 chunks
               + 2 * th * c_pad * in_b             # W2 chunks
               + 2 * (th + c_pad) * 4              # bias chunks
               + 2 * tm * c_pad * out_b            # output tiles
               + tm * c_pad * 4                    # f32 accumulator scratch
               + tm * th * (4 + in_b))             # h + gelu temps


def _resident_kernel(x_ref, w1_ref, b1_ref, w2_ref, b2_ref, o_ref, acc_ref, *,
                     th, n_h):
    # Weights fully VMEM-resident (constant index maps); chunk H in-kernel.
    acc_ref[...] = jnp.broadcast_to(b2_ref[...], acc_ref.shape)   # init with b2

    def body(k, carry):
        off = pl.multiple_of(k * th, 128)
        h = jnp.dot(x_ref[...], w1_ref[:, pl.ds(off, th)],
                    preferred_element_type=jnp.float32) + b1_ref[:, pl.ds(off, th)]
        g = _gelu_tanh(h)
        acc_ref[...] += jnp.dot(g.astype(w2_ref.dtype), w2_ref[pl.ds(off, th), :],
                                preferred_element_type=jnp.float32)
        return carry

    lax.fori_loop(0, n_h, body, 0, unroll=(n_h <= 4))
    o_ref[...] = acc_ref[...].astype(o_ref.dtype)


def _stream_kernel(x_ref, w1_ref, b1_ref, w2_ref, b2_ref, o_ref, acc_ref):
    k = pl.program_id(1)

    @pl.when(k == 0)
    def _():
        acc_ref[...] = jnp.broadcast_to(b2_ref[...], acc_ref.shape)  # init with b2

    h = jnp.dot(x_ref[...], w1_ref[...],
                preferred_element_type=jnp.float32) + b1_ref[...]
    g = _gelu_tanh(h)
    acc_ref[...] += jnp.dot(g.astype(w2_ref.dtype), w2_ref[...],
                            preferred_element_type=jnp.float32)

    @pl.when(k == pl.num_programs(1) - 1)
    def _():
        o_ref[...] = acc_ref[...].astype(o_ref.dtype)


def mlp_prepare_weights(w1, b1, w2, b2, *, compute_dtype=jnp.bfloat16):
    """Pad + cast weights ONCE (hoisted out of the per-forward path)."""
    C, H = w1.shape
    assert w2.shape == (H, C) and b1.shape == (H,) and b2.shape == (C,)
    c_pad, h_pad = _align_dim(C), _align_dim(H)
    w1p = jnp.pad(w1, ((0, c_pad - C), (0, h_pad - H))).astype(compute_dtype)
    w2p = jnp.pad(w2, ((0, h_pad - H), (0, c_pad - C))).astype(compute_dtype)
    b1p = jnp.pad(b1, (0, h_pad - H)).astype(jnp.float32).reshape(1, h_pad)
    b2p = jnp.pad(b2, (0, c_pad - C)).astype(jnp.float32).reshape(1, c_pad)
    return {"w1": w1p, "b1": b1p, "w2": w2p, "b2": b2p,
            "C": C, "H": H, "C_pad": c_pad, "H_pad": h_pad,
            "compute_dtype": compute_dtype}


def mlp_forward_prepared(x, params, *, tm_target=512, th_max=1024):
    """x: (B, T, C) -> (B, T, C), weights pre-padded/cast by mlp_prepare_weights."""
    B, T, C = x.shape
    assert C == params["C"]
    c_pad, h_pad = params["C_pad"], params["H_pad"]
    compute_dtype = params["compute_dtype"]
    w1p, b1p, w2p, b2p = params["w1"], params["b1"], params["w2"], params["b2"]

    M = B * T
    in_b = jnp.dtype(compute_dtype).itemsize
    out_b = jnp.dtype(x.dtype).itemsize

    tm = _pick_tm(M, tm_target)
    m_pad = _round_up(M, tm)
    th = _pick_h_chunk(h_pad, th_max)

    budget = min(int(0.75 * _vmem_capacity_bytes()), 100 << 20)

    resident_est = _vmem_resident_bytes(tm, c_pad, h_pad, th, in_b, out_b)
    use_resident = resident_est + (2 << 20) <= budget

    if use_resident:
        n_h = h_pad // th
        kernel = partial(_resident_kernel, th=th, n_h=n_h)
        grid = (m_pad // tm,)
        in_specs = [
            pl.BlockSpec((tm, c_pad), lambda i: (i, 0)),        # x tile
            pl.BlockSpec((c_pad, h_pad), lambda i: (0, 0)),     # W1 (resident)
            pl.BlockSpec((1, h_pad), lambda i: (0, 0)),         # b1 (resident)
            pl.BlockSpec((h_pad, c_pad), lambda i: (0, 0)),     # W2 (resident)
            pl.BlockSpec((1, c_pad), lambda i: (0, 0)),         # b2 (resident)
        ]
        out_specs = pl.BlockSpec((tm, c_pad), lambda i: (i, 0))
        dim_sem = ("parallel",)
        vmem_est = resident_est
    else:
        # Streaming mode: shrink th, then tm, until the working set fits.
        while (_vmem_stream_bytes(tm, c_pad, th, in_b, out_b) + (2 << 20) > budget
               and th > 128):
            th = _pick_h_chunk(h_pad, th // 2)
        while (_vmem_stream_bytes(tm, c_pad, th, in_b, out_b) + (2 << 20) > budget
               and tm > 16):
            tm = max(16, _round_up(tm // 2, 16))
        m_pad = _round_up(M, tm)
        kernel = _stream_kernel
        grid = (m_pad // tm, h_pad // th)     # M parallel, H reduction last
        in_specs = [
            pl.BlockSpec((tm, c_pad), lambda i, k: (i, 0)),     # x tile
            pl.BlockSpec((c_pad, th), lambda i, k: (0, k)),     # W1 chunk
            pl.BlockSpec((1, th), lambda i, k: (0, k)),         # b1 chunk
            pl.BlockSpec((th, c_pad), lambda i, k: (k, 0)),     # W2 chunk
            pl.BlockSpec((1, c_pad), lambda i, k: (0, 0)),      # b2
        ]
        out_specs = pl.BlockSpec((tm, c_pad), lambda i, k: (i, 0))
        dim_sem = ("parallel", "arbitrary")
        vmem_est = _vmem_stream_bytes(tm, c_pad, th, in_b, out_b)

    x2d = x.reshape(M, C)
    x2d = jnp.pad(x2d, ((0, m_pad - M), (0, c_pad - C))).astype(compute_dtype)

    cost = pl.CostEstimate(
        flops=int(4 * m_pad * c_pad * h_pad),            # two matmuls
        transcendentals=int(m_pad * h_pad),              # tanh in GELU
        bytes_accessed=int(x2d.size * in_b + w1p.size * in_b + w2p.size * in_b
                           + b1p.size * 4 + b2p.size * 4 + m_pad * c_pad * out_b),
    )

    vmem_limit = int(min(budget, max(vmem_est + (4 << 20), 32 << 20)))

    out2d = pl.pallas_call(
        kernel,
        out_shape=jax.ShapeDtypeStruct((m_pad, c_pad), x.dtype),
        grid_spec=pltpu.PrefetchScalarGridSpec(
            num_scalar_prefetch=0,
            grid=grid,
            in_specs=in_specs,
            out_specs=out_specs,
            scratch_shapes=[pltpu.VMEM((tm, c_pad), jnp.float32)],
        ),
        compiler_params=pltpu.CompilerParams(
            dimension_semantics=dim_sem,
            vmem_limit_bytes=vmem_limit,
        ),
        cost_estimate=cost,
    )(x2d, w1p, b1p, w2p, b2p)

    return out2d[:M, :C].reshape(B, T, C)


def mlp_forward(x, w1, b1, w2, b2, **kw):
    """Convenience wrapper (prefer preparing weights once and reusing them)."""
    return mlp_forward_prepared(x, mlp_prepare_weights(w1, b1, w2, b2), **kw)


if __name__ == "__main__":
    # Small GPT-like config: batch=2, seq=8, n_embd=32 -> hidden=128.
    B, T, C = 2, 8, 32
    H = 4 * C

    key = jax.random.PRNGKey(0)
    kx, k1, kb1, k2, kb2 = jax.random.split(key, 5)

    x = jax.random.normal(kx, (B, T, C), dtype=jnp.float32)

    # Deterministic init; weights stored pre-transposed as (in, out).
    w1 = jax.random.normal(k1, (C, H), dtype=jnp.float32) * (1.0 / math.sqrt(C))
    b1 = jax.random.normal(kb1, (H,), dtype=jnp.float32) * 0.01
    w2 = jax.random.normal(k2, (H, C), dtype=jnp.float32) * (1.0 / math.sqrt(H))
    b2 = jax.random.normal(kb2, (C,), dtype=jnp.float32) * 0.01

    params = mlp_prepare_weights(w1, b1, w2, b2)      # pad/cast hoisted, done once
    out = mlp_forward_prepared(x, params)
    jax.block_until_ready(out)

    # Pure-JAX reference with the same bf16 input quantization (f32 accumulate),
    # matching the kernel's bf16-in / f32-acc MXU path.
    q = lambda a: a.astype(jnp.bfloat16).astype(jnp.float32)
    h_ref = q(x) @ q(w1) + b1
    g_ref = _gelu_tanh(h_ref)
    ref = q(g_ref) @ q(w2) + b2
    assert jnp.allclose(out, ref, atol=1e-2, rtol=1e-2), "mismatch vs reference"

    print("KERNEL_OK")
</pallas_src>

<mosaic_0001>
module attributes {stable_mosaic.version = 11 : i64} {
  func.func @_resident_kernel(%arg0: i32, %arg1: memref<16x128xbf16, #tpu.memory_space<vmem>>, %arg2: memref<128x128xbf16, #tpu.memory_space<vmem>>, %arg3: memref<1x128xf32, #tpu.memory_space<vmem>>, %arg4: memref<128x128xbf16, #tpu.memory_space<vmem>>, %arg5: memref<1x128xf32, #tpu.memory_space<vmem>>, %arg6: memref<16x128xf32, #tpu.memory_space<vmem>>, %arg7: memref<16x128xf32, #tpu.memory_space<vmem>>) attributes {dimension_semantics = [#tpu.dimension_semantics<parallel>], iteration_bounds = array<i64: 1>, scalar_prefetch = 0 : i64, scratch_operands = 1 : i64, tpu.core_type = #tpu.core_type<tc>, window_params = [{transform_indices = @transform_0, window_bounds = array<i64: 16, 128>}, {pipeline_mode = #tpu.pipeline_mode<synchronous>, transform_indices = @transform_1, window_bounds = array<i64: 128, 128>}, {pipeline_mode = #tpu.pipeline_mode<synchronous>, transform_indices = @transform_2, window_bounds = array<i64: 1, 128>}, {pipeline_mode = #tpu.pipeline_mode<synchronous>, transform_indices = @transform_3, window_bounds = array<i64: 128, 128>}, {pipeline_mode = #tpu.pipeline_mode<synchronous>, transform_indices = @transform_4, window_bounds = array<i64: 1, 128>}, {transform_indices = @transform_5, window_bounds = array<i64: 16, 128>}]} {
    %c0 = arith.constant 0 : index
    %c0_0 = arith.constant 0 : index
    %0 = vector.load %arg5[%c0, %c0_0] : memref<1x128xf32, #tpu.memory_space<vmem>>, vector<1x128xf32>
    %1 = vector.shape_cast %0 : vector<1x128xf32> to vector<1x128xf32>
    %2 = vector.broadcast %1 : vector<1x128xf32> to vector<16x128xf32>
    %c0_1 = arith.constant 0 : index
    %c0_2 = arith.constant 0 : index
    %3 = vector.load %arg7[%c0_1, %c0_2] : memref<16x128xf32, #tpu.memory_space<vmem>>, vector<16x128xf32>
    tpu.vector_store %arg7[%c0_1, %c0_2], %2 {strides = array<i32>} : memref<16x128xf32, #tpu.memory_space<vmem>>, vector<16x128xf32>,
    %c0_i32 = arith.constant 0 : i32
    %c128_i32 = arith.constant 128 : i32
    %4 = arith.muli %c0_i32, %c128_i32 : i32
    %5 = tpu.assume_multiple %4, 128 : i32
    %c0_3 = arith.constant 0 : index
    %c0_4 = arith.constant 0 : index
    %6 = vector.load %arg1[%c0_3, %c0_4] : memref<16x128xbf16, #tpu.memory_space<vmem>>, vector<16x128xbf16>
    %c0_5 = arith.constant 0 : index
    %7 = arith.index_cast %5 : i32 to index
    %8 = vector.load %arg2[%c0_5, %7] : memref<128x128xbf16, #tpu.memory_space<vmem>>, vector<128x128xbf16>
    %cst = arith.constant dense<0.000000e+00> : vector<16x128xf32>
    %9 = tpu.matmul %6, %8, %cst {dimension_numbers = #tpu.dot_dimension_numbers<[1], [0], [0], [1], [0, 0, 1, 1], [], []>} : vector<16x128xbf16>, vector<128x128xbf16>, vector<16x128xf32> -> vector<16x128xf32>
    %c0_6 = arith.constant 0 : index
    %10 = arith.index_cast %5 : i32 to index
    %11 = vector.load %arg3[%c0_6, %10] : memref<1x128xf32, #tpu.memory_space<vmem>>, vector<1x128xf32>
    %12 = vector.broadcast %11 : vector<1x128xf32> to vector<16x128xf32>
    %13 = arith.addf %9, %12 : vector<16x128xf32>
    %cst_7 = arith.constant 5.000000e-01 : f32
    %14 = vector.broadcast %cst_7 : f32 to vector<16x128xf32>
    %15 = arith.mulf %14, %13 : vector<16x128xf32>
    %cst_8 = arith.constant 4.471500e-02 : f32
    %16 = vector.broadcast %cst_8 : f32 to vector<16x128xf32>
    %17 = arith.mulf %16, %13 : vector<16x128xf32>
    %18 = arith.mulf %17, %13 : vector<16x128xf32>
    %19 = arith.mulf %18, %13 : vector<16x128xf32>
    %20 = arith.addf %13, %19 : vector<16x128xf32>
    %cst_9 = arith.constant 0.797884583 : f32
    %21 = vector.broadcast %cst_9 : f32 to vector<16x128xf32>
    %22 = arith.mulf %21, %20 : vector<16x128xf32>
    %23 = math.tanh %22 : vector<16x128xf32>
    %cst_10 = arith.constant 1.000000e+00 : f32
    %24 = vector.broadcast %cst_10 : f32 to vector<16x128xf32>
    %25 = arith.addf %24, %23 : vector<16x128xf32>
    %26 = arith.mulf %15, %25 : vector<16x128xf32>
    %c0_11 = arith.constant 0 : index
    %c0_12 = arith.constant 0 : index
    %27 = vector.load %arg7[%c0_11, %c0_12] : memref<16x128xf32, #tpu.memory_space<vmem>>, vector<16x128xf32>
    %28 = arith.truncf %26 : vector<16x128xf32> to vector<16x128xbf16>
    %29 = arith.index_cast %5 : i32 to index
    %c0_13 = arith.constant 0 : index
    %30 = vector.load %arg4[%29, %c0_13] : memref<128x128xbf16, #tpu.memory_space<vmem>>, vector<128x128xbf16>
    %cst_14 = arith.constant dense<0.000000e+00> : vector<16x128xf32>
    %31 = tpu.matmul %28, %30, %cst_14 {dimension_numbers = #tpu.dot_dimension_numbers<[1], [0], [0], [1], [0, 0, 1, 1], [], []>} : vector<16x128xbf16>, vector<128x128xbf16>, vector<16x128xf32> -> vector<16x128xf32>
    %32 = arith.addf %27, %31 : vector<16x128xf32>
    %c0_15 = arith.constant 0 : index
    %c0_16 = arith.constant 0 : index
    %33 = vector.load %arg7[%c0_15, %c0_16] : memref<16x128xf32, #tpu.memory_space<vmem>>, vector<16x128xf32>
    tpu.vector_store %arg7[%c0_15, %c0_16], %32 {strides = array<i32>} : memref<16x128xf32, #tpu.memory_space<vmem>>, vector<16x128xf32>,
    %c1_i32 = arith.constant 1 : i32
    %c0_17 = arith.constant 0 : index
    %c0_18 = arith.constant 0 : index
    %34 = vector.load %arg7[%c0_17, %c0_18] : memref<16x128xf32, #tpu.memory_space<vmem>>, vector<16x128xf32>
    %c0_19 = arith.constant 0 : index
    %c0_20 = arith.constant 0 : index
    %35 = vector.load %arg6[%c0_19, %c0_20] : memref<16x128xf32, #tpu.memory_space<vmem>>, vector<16x128xf32>
    tpu.vector_store %arg6[%c0_19, %c0_20], %34 {strides = array<i32>} : memref<16x128xf32, #tpu.memory_space<vmem>>, vector<16x128xf32>,
    return
  }
  func.func @transform_0(%arg0: i32) -> (i32, i32) {
    %c0_i32 = arith.constant 0 : i32
    %c0_i32_0 = arith.constant 0 : i32
    return %arg0, %c0_i32 : i32, i32
  }
  func.func @transform_1(%arg0: i32) -> (i32, i32) {
    %c0_i32 = arith.constant 0 : i32
    %c0_i32_0 = arith.constant 0 : i32
    %c0_i32_1 = arith.constant 0 : i32
    return %c0_i32, %c0_i32_0 : i32, i32
  }
  func.func @transform_2(%arg0: i32) -> (i32, i32) {
    %c0_i32 = arith.constant 0 : i32
    %c0_i32_0 = arith.constant 0 : i32
    %c0_i32_1 = arith.constant 0 : i32
    return %c0_i32, %c0_i32_0 : i32, i32
  }
  func.func @transform_3(%arg0: i32) -> (i32, i32) {
    %c0_i32 = arith.constant 0 : i32
    %c0_i32_0 = arith.constant 0 : i32
    %c0_i32_1 = arith.constant 0 : i32
    return %c0_i32, %c0_i32_0 : i32, i32
  }
  func.func @transform_4(%arg0: i32) -> (i32, i32) {
    %c0_i32 = arith.constant 0 : i32
    %c0_i32_0 = arith.constant 0 : i32
    %c0_i32_1 = arith.constant 0 : i32
    return %c0_i32, %c0_i32_0 : i32, i32
  }
  func.func @transform_5(%arg0: i32) -> (i32, i32) {
    %c0_i32 = arith.constant 0 : i32
    %c0_i32_0 = arith.constant 0 : i32
    return %arg0, %c0_i32 : i32, i32
  }
}

</mosaic_0001>

<bundles_post_ra>
// kernel: tpu_custom_call.1
= control target key start
LH: loop header
LB: loop body
LE: loop exit
PB: predicated region body
PF: predicated region fallthrough
CT: control target
= control target key end

     0   :  { %10 = vsyncpa [#allocation4], 0  ;;  %s596_s0 = inlined_call_operand.hbm [shape: bf16[16,128], index: 0, kind: input, shape index: {}]   ;;  %s597_s1 = inlined_call_operand.hbm [shape: bf16[128,128], index: 1, kind: input, shape index: {}]   ;;  %s598_s2 = inlined_call_operand.vmem [shape: f32[1,128], index: 2, kind: input, shape index: {}]   ;;  %s599_s3 = inlined_call_operand.hbm [shape: bf16[128,128], index: 3, kind: input, shape index: {}]   ;;  %s600_s4 = inlined_call_operand.vmem [shape: f32[1,128], index: 4, kind: input, shape index: {}]   ;;  %s601_s5 = inlined_call_operand.hbm [shape: f32[16,128], index: 5, kind: output, shape index: {}]  }
   0x1   :  { %11 = vsyncpa [#allocation7], 0 }
   0x2   :  { %12 = vsyncpa [#allocation5], 0  ;;  %s538_s18 = smov [#allocation6]   ;;  %s539_s20 = smov [#allocation3]  }
   0x3   :  { %s30_s19 = sshll.u32 %s538_s18, 4  ;;  %s18_s21 = sshll.u32 %s539_s20, 4  ;;  %s31_s19 = int_to_ptr.vmem [resolvable:$true] %s30_s19  ;;  %s19_s21 = int_to_ptr.vmem [resolvable:$true] %s18_s21 }
   0x4   :  { %s460_s22 = scalar_lea.vmem %s31_s19, 1024  ;;  %p465_p1 = scmp.lt.s32.totalorder %s31_s19, %s31_s19 }
   0x5   :  { %p461_p0 = scmp.ne.s32.totalorder %s31_s19, %s460_s22  ;;  %p466_p2 = scmp.lt.s32.totalorder %s460_s22, %s460_s22 }
   0x7   :  { %p467_p3 = por %p466_p2, %p465_p1 }
   0x9   :  { %p468_p4 = pnand %p467_p3, %p461_p0 }
   0xb   :  { %471 = shalt.err (!%p468_p4)
}
   0xc   :  { %s540_s23 = smov 64   ;;  %s541_s24 = smov 4  }
   0xd   :  { %36 = dma.hbm_to_vmem [thread:$0]  %s597_s1, 1024, %s31_s19, [#allocation7], %s540_s23, %s540_s23, %s541_s24  }
   0xe   :  { %s480_s27 = scalar_lea.vmem %s19_s21, 128  ;;  %p485_p6 = scmp.lt.s32.totalorder %s19_s21, %s19_s21 }
   0xf   :  { %p481_p5 = scmp.ne.s32.totalorder %s19_s21, %s480_s27  ;;  %p486_p7 = scmp.lt.s32.totalorder %s480_s27, %s480_s27 }
  0x11   :  { %p487_p8 = por %p486_p7, %p485_p6 }
  0x13   :  { %p488_p9 = pnand %p487_p8, %p481_p5 }
  0x15   :  { %491 = shalt.err (!%p488_p9)
}
  0x16   :  { %24 = dma.hbm_to_vmem [thread:$0]  %s596_s0, 128, %s19_s21, [#allocation4], %s540_s23, %s540_s23, %s541_s24  }
  0x17   :  { %s542_s30 = smov [#allocation8]  }
  0x18   :  { %s44_s6 = sshll.u32 %s542_s30, 4  ;;  %s45_s6 = int_to_ptr.vmem [resolvable:$true] %s44_s6 }
  0x19   :  { %s500_s7 = scalar_lea.vmem %s45_s6, 1024  ;;  %p505_p11 = scmp.lt.s32.totalorder %s45_s6, %s45_s6 }
  0x1a   :  { %p501_p10 = scmp.ne.s32.totalorder %s45_s6, %s500_s7  ;;  %p506_p12 = scmp.lt.s32.totalorder %s500_s7, %s500_s7 }
  0x1c   :  { %p507_p13 = por %p506_p12, %p505_p11 }
  0x1e   :  { %p508_p0 = pnand %p507_p13, %p501_p10 }
  0x20   :  { %511 = shalt.err (!%p508_p0)
}
  0x21   :  { %50 = dma.hbm_to_vmem [thread:$0]  %s599_s3, 1024, %s45_s6, [#allocation7], %s540_s23, %s540_s23, %s541_s24  }
  0x22   :  { %532 = dma.done.wait [#allocation4], 128  }
  0x23   :  { %533 = vsyncadd [#allocation4], 4294967168 }
  0x24   :  { %534 = dma.done.wait [#allocation7], 2048  }
  0x25   :  { %535 = vsyncadd [#allocation7], 4294965248  ;;  %v543_v0 = vmov 0.0   ;;  %vm544_vm0 = vmmov 0   ;;  %v431_v1 = vld [vmem:[#allocation6 + $0x38] sm:$0xff]   ;;  %v432_v2 = vld [vmem:[#allocation6 + $0x30] sm:$0xff]  }
  0x26   :  { %381 = vmatprep.subr.bf16.mxu0 %v543_v0  ;;  %397 = vmatprep.mubr.msk.bf16.mxu0 %vm544_vm0, %v543_v0  ;;  %v433_v3 = vld [vmem:[#allocation6 + $0x28] sm:$0xff]   ;;  %v434_v4 = vld [vmem:[#allocation6 + $0x20] sm:$0xff]   ;;  %v435_v5 = vld [vmem:[#allocation6 + $0x18] sm:$0xff]   ;;  %s545_s10 = smov [#allocation9]  }
  0x27   :  { %401 = vmatprep.subr.bf16.mxu1 %v543_v0  ;;  %417 = vmatprep.mubr.msk.bf16.mxu1 %vm544_vm0, %v543_v0  ;;  %v436_v6 = vld [vmem:[#allocation6 + $0x10] sm:$0xff]   ;;  %v437_v7 = vld [vmem:[#allocation6 + $0x8] sm:$0xff]   ;;  %v438_v8 = vld [vmem:[#allocation6] sm:$0xff]   ;;  %s331_s11 = sshll.u32 %s545_s10, 4  ;;  %s332_s11 = int_to_ptr.vmem [resolvable:$true] %s331_s11 }
  0x28   :  { %382 = vmatpush3.bf16.msra.mxu0 %v431_v1  ;;  %v439_v9 = vld [vmem:[#allocation3] sm:$0xff]   ;;  %v441_v11 = vld [vmem:[#allocation8 + $0x30] sm:$0xff]   ;;  %v442_v12 = vld [vmem:[#allocation8 + $0x28] sm:$0xff]   ;;  %s512_s12 = scalar_lea.vmem %s332_s11, 256  ;;  %p517_p2 = scmp.lt.s32.totalorder %s332_s11, %s332_s11 }
  0x29   :  { %383 = vmatprep.subr.bf16.mxu0 %v543_v0  ;;  %v440_v10 = vld [vmem:[#allocation8 + $0x38] sm:$0xff]   ;;  %v443_v13 = vld [vmem:[#allocation8 + $0x20] sm:$0xff]   ;;  %v445_v15 = vld [vmem:[#allocation8 + $0x10] sm:$0xff]   ;;  %p513_p1 = scmp.ne.s32.totalorder %s332_s11, %s512_s12  ;;  %p518_p3 = scmp.lt.s32.totalorder %s512_s12, %s512_s12 }
  0x2a   :  { %402 = vmatpush3.bf16.msra.mxu1 %v440_v10  ;;  %v444_v14 = vld [vmem:[#allocation8 + $0x18] sm:$0xff]   ;;  %v446_v16 = vld [vmem:[#allocation8 + $0x8] sm:$0xff]   ;;  %v447_v17 = vld [vmem:[#allocation8] sm:$0xff]  }
  0x2b   :  { %403 = vmatprep.subr.bf16.mxu1 %v543_v0  ;;  %v345_v18 = vld [vmem:[%s598_s2] ss:$0 sm:$0xff]  ;;  %p519_p4 = por %p518_p3, %p517_p2 }
  0x2c   :  { %384 = vmatpush3.bf16.msra.mxu0 %v432_v2  ;;  %v344_v44 = vld [vmem:[%s600_s4] ss:$0 sm:$0xff] }
  0x2d   :  { %385 = vmatprep.subr.bf16.mxu0 %v543_v0  ;;  %p520_p5 = pnand %p519_p4, %p513_p1 }
  0x2e   :  { %404 = vmatpush3.bf16.msra.mxu1 %v441_v11 }
  0x2f   :  { %405 = vmatprep.subr.bf16.mxu1 %v543_v0 }
  0x30   :  { %386 = vmatpush3.bf16.msra.mxu0 %v433_v3 }
  0x31   :  { %387 = vmatprep.subr.bf16.mxu0 %v543_v0 }
  0x32   :  { %406 = vmatpush3.bf16.msra.mxu1 %v442_v12 }
  0x33   :  { %407 = vmatprep.subr.bf16.mxu1 %v543_v0 }
  0x34   :  { %388 = vmatpush3.bf16.msra.mxu0 %v434_v4 }
  0x35   :  { %389 = vmatprep.subr.bf16.mxu0 %v543_v0 }
  0x36   :  { %408 = vmatpush3.bf16.msra.mxu1 %v443_v13 }
  0x37   :  { %409 = vmatprep.subr.bf16.mxu1 %v543_v0 }
  0x38   :  { %390 = vmatpush3.bf16.msra.mxu0 %v435_v5 }
  0x39   :  { %391 = vmatprep.subr.bf16.mxu0 %v543_v0 }
  0x3a   :  { %410 = vmatpush3.bf16.msra.mxu1 %v444_v14 }
  0x3b   :  { %411 = vmatprep.subr.bf16.mxu1 %v543_v0 }
  0x3c   :  { %392 = vmatpush3.bf16.msra.mxu0 %v436_v6 }
  0x3d   :  { %393 = vmatprep.subr.bf16.mxu0 %v543_v0 }
  0x3e   :  { %412 = vmatpush3.bf16.msra.mxu1 %v445_v15 }
  0x3f   :  { %413 = vmatprep.subr.bf16.mxu1 %v543_v0 }
  0x40   :  { %394 = vmatpush3.bf16.msra.mxu0 %v437_v7 }
  0x41   :  { %395 = vmatprep.subr.bf16.mxu0 %v543_v0 }
  0x42   :  { %414 = vmatpush3.bf16.msra.mxu1 %v446_v16 }
  0x43   :  { %415 = vmatprep.subr.bf16.mxu1 %v543_v0 }
  0x44   :  { %396 = vmatpush3.bf16.msra.mxu0 %v438_v8 }
  0x46   :  { %416 = vmatpush3.bf16.msra.mxu1 %v447_v17 }
  0x47   :  { %398 = vmatmul.mubr.bf16.vlgmr.msra.gmra.mxu0 %v439_v9 }
 0x107   :  { %v185_v19 = vpop.f32.mrf.mxu0 }
 0x108   :  { %v186_v20 = vadd.f32 %v345_v18, %v185_v19 }
 0x109   :  { %v399_v21 = vpop.f32.mrf.mxu0 }
 0x10a   :  { %v194_v22 = vmul.f32 0.044715, %v186_v20  ;;  %v192_v38 = vmul.f32 0.5, %v186_v20 }
 0x10b   :  { %v188_v23 = vpop.f32.mrf.mxu0 }
 0x10c   :  { %v196_v24 = vmul.f32 %v194_v22, %v186_v20  ;;  %v189_v25 = vadd.f32 %v345_v18, %v188_v23 }
 0x10d   :  { %v400_v26 = vpop.f32.mrf.mxu0 }
 0x10e   :  { %v198_v27 = vmul.f32 %v196_v24, %v186_v20  ;;  %v195_v28 = vmul.f32 0.044715, %v189_v25  ;;  %v193_v39 = vmul.f32 0.5, %v189_v25 }
 0x110   :  { %v197_v29 = vmul.f32 %v195_v28, %v189_v25  ;;  %v200_v30 = vadd.f32 %v198_v27, %v186_v20 }
 0x112   :  { %v199_v31 = vmul.f32 %v197_v29, %v189_v25  ;;  %v202_v32 = vmul.f32 0.7978846, %v200_v30 }
 0x114   :  { %v201_v33 = vadd.f32 %v199_v31, %v189_v25  ;;  %448 = vtanh.f32 %v202_v32 }
 0x116   :  { %v203_v34 = vmul.f32 0.7978846, %v201_v33 }
 0x118   :  { %450 = vtanh.f32 %v203_v34 }
 0x121   :  { %v449_v35 = vpop.eup %448 }
 0x122   :  { %v206_v36 = vadd.f32 1.0, %v449_v35 }
 0x124   :  { %v208_v41 = vmul.f32 %v206_v36, %v192_v38 }
 0x125   :  { %v451_v37 = vpop.eup %450 }
 0x126   :  { %v207_v40 = vadd.f32 1.0, %v451_v37 }
 0x128   :  { %v209_v42 = vmul.f32 %v207_v40, %v193_v39 }
 0x12a   :  { %v212_v43 = vpack.c.bf16 %v209_v42, %v208_v41 }
 0x12c   :  { %418 = vmatmul.mubr.bf16.vlgmr.msra.gmra.mxu1 %v212_v43 }
 0x1ec   :  { %v311_v45 = vpop.f32.mrf.mxu1 }
 0x1ed   :  { %v318_v46 = vadd.f32 %v344_v44, %v311_v45 }
 0x1ee   :  { %v419_v47 = vpop.f32.mrf.mxu1 }
 0x1ef   :  { %324 = vst [vmem:[#allocation9] sm:$0xff] %v318_v46 }
 0x1f0   :  { %v314_v48 = vpop.f32.mrf.mxu1 }
 0x1f1   :  { %v319_v49 = vadd.f32 %v344_v44, %v314_v48 }
 0x1f2   :  { %v420_v50 = vpop.f32.mrf.mxu1 }
 0x1f3   :  { %325 = vst [vmem:[#allocation9 + $0x8] sm:$0xff] %v319_v49 }
 0x1f4   :  { %523 = shalt.err (!%p520_p5)
}
 0x1f5   :  { %s546_s13 = smov 128   ;;  %s547_s4 = smov 8  }
 0x1f6   :  { %337 = dma.vmem_to_hbm [thread:$0]  %s332_s11, 256, %s601_s5, [#allocation5], %s546_s13, %s546_s13, %s547_s4  }
 0x1f7   :  { %536 = dma.done.wait [#allocation5], 256  }
 0x1f8   :  { %537 = vsyncadd [#allocation5], 4294967040 }
 0x1f9   :  { %341 = vsyncpa [#allocation4], 1 }
 0x1fa   :  { %342 = vsyncpa [#allocation7], 1 }
 0x1fb   :  { %343 = vsyncpa [#allocation5], 1 }

</bundles_post_ra>
